<compile_context>
chip_gen: v7x
topology: tpu7x:2x2x1
jax: 0.10.0
libtpu: 0.0.40
codegen_flags: <defaults>
</compile_context>

<pallas_src>
import math

import jax
import jax.numpy as jnp
import numpy as np
from jax import lax
from jax.experimental import pallas as pl
from jax.experimental.pallas import tpu as pltpu


def _round_up(a, m):
    return (a + m - 1) // m * m


def _pick_tile(total, want):
    """Largest multiple of 128 that divides `total` (a multiple of 128) and is <= want."""
    t = max(128, (min(want, total) // 128) * 128)
    while total % t != 0:
        t -= 128
    return t


# -----------------------------------------------------------------------------
# Kernel 1: fused 1x1-conv projections   q,k,v = W_all @ [x ; 1]
# -----------------------------------------------------------------------------
def _make_proj_kernel(c8p, cp):
    def kernel(x_ref, w_ref, q_ref, k_ref, v_ref):
        x = x_ref[0]                                              # (Cp+1, TN) mxu dtype
        qkv = jnp.dot(w_ref[...], x,
                      preferred_element_type=jnp.float32)         # (M, TN) f32
        # 8-aligned static row slices (q / k sections are zero-padded to C8p).
        q_ref[0] = qkv[0:c8p, :].astype(q_ref.dtype)
        k_ref[0] = qkv[c8p:2 * c8p, :].astype(k_ref.dtype)
        v_ref[0] = qkv[2 * c8p:2 * c8p + cp, :].astype(v_ref.dtype)
    return kernel


# -----------------------------------------------------------------------------
# Kernel 2: flash-style position attention + gamma * out + x residual
# -----------------------------------------------------------------------------
def _make_attn_kernel(cp, tq, tk, n_valid, n_pad):
    need_mask = (n_pad != n_valid)   # trace the key mask only if N was padded

    def kernel(x_ref, q_ref, k_ref, v_ref, gamma_ref, o_ref,
               m_ref, l_ref, acc_ref):
        j = pl.program_id(2)

        @pl.when(j == 0)
        def _init():
            m_ref[...] = jnp.full((1, tq), -jnp.inf, jnp.float32)
            l_ref[...] = jnp.zeros((1, tq), jnp.float32)
            acc_ref[...] = jnp.zeros((cp, tq), jnp.float32)

        q = q_ref[0]                                              # (C8p, TQ) bf16
        k = k_ref[0]                                              # (C8p, TK) bf16
        v = v_ref[0]                                              # (Cp,  TK) bf16

        # Score tile in (TK, TQ) layout: contract the channel dims directly so
        # neither q, k nor the attention tile is ever transposed, and the
        # per-query softmax stats come out as (1, TQ) which broadcasts natively
        # over the (Cp, TQ) accumulator (no per-step relayouts).
        s = lax.dot_general(k, q, (((0,), (0,)), ((), ())),
                            preferred_element_type=jnp.float32)   # (TK, TQ) f32

        if need_mask:
            key_idx = j * tk + lax.broadcasted_iota(jnp.int32, (tk, tq), 0)
            s = jnp.where(key_idx < n_valid, s, -1e30)

        m_prev = m_ref[...]                                                 # (1, TQ)
        m_new = jnp.maximum(m_prev, jnp.max(s, axis=0, keepdims=True))      # (1, TQ)
        alpha = jnp.exp(m_prev - m_new)                                     # (1, TQ)
        p = jnp.exp(s - m_new)                                              # (TK, TQ) f32
        l_ref[...] = alpha * l_ref[...] + jnp.sum(p, axis=0, keepdims=True)
        acc_ref[...] = alpha * acc_ref[...] + lax.dot_general(
            v, p.astype(v.dtype), (((1,), (0,)), ((), ())),
            preferred_element_type=jnp.float32)                             # (Cp, TQ)
        m_ref[...] = m_new

        @pl.when(j == pl.num_programs(2) - 1)
        def _finalize():
            gamma = gamma_ref[0]                                  # SMEM scalar
            inv_l = pl.reciprocal(l_ref[...], approx=True)        # EUP slot, ~free
            out = gamma * (acc_ref[...] * inv_l) + x_ref[0]       # (Cp, TQ) f32
            o_ref[0] = out.astype(o_ref.dtype)

    return kernel


# -----------------------------------------------------------------------------
# Wrapper
# -----------------------------------------------------------------------------
def pam_forward(x, wq, bq, wk, bk, wv, bv, gamma, *,
                tq=128, tk=128, mxu_dtype=jnp.bfloat16, vmem_limit_bytes=None):
    """PAM_Module forward.  x: (B, C, H, W) -> (B, C, H, W)."""
    B, C, H, W = x.shape
    N = H * W
    C8 = wq.shape[0]

    # Padded sizes: channels to multiples of 8 (sublanes), spatial to 128 (lanes).
    cp = _round_up(C, 8)
    c8p = _round_up(max(C8, 8), 8)
    n_pad = _round_up(N, 128)
    tq = _pick_tile(n_pad, tq)
    tk = _pick_tile(n_pad, tk)
    tn = _pick_tile(n_pad, 512)           # projection spatial tile
    m_rows = 2 * c8p + cp                 # fused projection output rows
    mxu_bytes = np.dtype(mxu_dtype).itemsize

    f32 = jnp.float32
    x_flat = x.reshape(B, C, N).astype(f32)

    # Exact f32 residual input, zero padded.
    x_res = jnp.zeros((B, cp, n_pad), f32).at[:, :C, :N].set(x_flat)

    # Projection input with an extra all-ones channel (bias folding), bf16 for MXU.
    x_aug = jnp.zeros((B, cp + 1, n_pad), f32)
    x_aug = x_aug.at[:, :C, :N].set(x_flat)
    x_aug = x_aug.at[:, cp, :].set(1.0)
    x_aug = x_aug.astype(mxu_dtype)

    # Fused [Wq; Wk; Wv] weight, each section zero-padded to an 8-aligned row
    # start, with the biases folded into the last (ones-channel) column.
    w_all = jnp.zeros((m_rows, cp + 1), f32)
    w_all = w_all.at[0:C8, 0:C].set(wq).at[0:C8, cp].set(bq)
    w_all = w_all.at[c8p:c8p + C8, 0:C].set(wk).at[c8p:c8p + C8, cp].set(bk)
    w_all = w_all.at[2 * c8p:2 * c8p + C, 0:C].set(wv).at[2 * c8p:2 * c8p + C, cp].set(bv)
    w_all = w_all.astype(mxu_dtype)

    gamma_arr = jnp.asarray(gamma, f32).reshape(-1)[:1]          # (1,) -> SMEM

    # ---- kernel 1: fused q/k/v projection ------------------------------------
    proj_cost = pl.CostEstimate(
        flops=int(2 * B * m_rows * (cp + 1) * n_pad),
        transcendentals=0,
        bytes_accessed=int((B * (cp + 1) * n_pad + m_rows * (cp + 1)) * mxu_bytes
                           + B * (2 * c8p + cp) * n_pad * mxu_bytes),
    )
    q, k, v = pl.pallas_call(
        _make_proj_kernel(c8p, cp),
        out_shape=(
            jax.ShapeDtypeStruct((B, c8p, n_pad), mxu_dtype),
            jax.ShapeDtypeStruct((B, c8p, n_pad), mxu_dtype),
            jax.ShapeDtypeStruct((B, cp, n_pad), mxu_dtype),
        ),
        grid_spec=pltpu.PrefetchScalarGridSpec(
            num_scalar_prefetch=0,
            grid=(B, n_pad // tn),
            in_specs=[
                pl.BlockSpec((1, cp + 1, tn), lambda b, n: (b, 0, n)),   # x_aug
                pl.BlockSpec((m_rows, cp + 1), lambda b, n: (0, 0)),     # W_all
            ],
            out_specs=(
                pl.BlockSpec((1, c8p, tn), lambda b, n: (b, 0, n)),      # q
                pl.BlockSpec((1, c8p, tn), lambda b, n: (b, 0, n)),      # k
                pl.BlockSpec((1, cp, tn), lambda b, n: (b, 0, n)),       # v
            ),
        ),
        compiler_params=pltpu.CompilerParams(
            dimension_semantics=("parallel", "parallel"),
            vmem_limit_bytes=vmem_limit_bytes),
        cost_estimate=proj_cost,
    )(x_aug, w_all)

    # ---- kernel 2: tiled attention + residual ---------------------------------
    n_q_tiles = n_pad // tq
    n_k_tiles = n_pad // tk
    attn_cost = pl.CostEstimate(
        flops=int(2 * B * n_pad * n_pad * (c8p + cp)),
        transcendentals=int(B * n_pad * n_pad),
        bytes_accessed=int(B * cp * n_pad * 4                          # x residual
                           + B * c8p * n_pad * mxu_bytes               # q
                           + n_q_tiles * B * (c8p + cp) * n_pad * mxu_bytes  # k,v re-reads
                           + B * cp * n_pad * 4),                      # output
    )
    out_pad = pl.pallas_call(
        _make_attn_kernel(cp, tq, tk, N, n_pad),
        out_shape=jax.ShapeDtypeStruct((B, cp, n_pad), x.dtype),
        grid_spec=pltpu.PrefetchScalarGridSpec(
            num_scalar_prefetch=0,
            grid=(B, n_q_tiles, n_k_tiles),
            in_specs=[
                pl.BlockSpec((1, cp, tq), lambda b, i, j: (b, 0, i)),    # x (residual)
                pl.BlockSpec((1, c8p, tq), lambda b, i, j: (b, 0, i)),   # q tile
                pl.BlockSpec((1, c8p, tk), lambda b, i, j: (b, 0, j)),   # k tile
                pl.BlockSpec((1, cp, tk), lambda b, i, j: (b, 0, j)),    # v tile
                pl.BlockSpec(memory_space=pltpu.MemorySpace.SMEM),       # gamma scalar
            ],
            out_specs=pl.BlockSpec((1, cp, tq), lambda b, i, j: (b, 0, i)),
            scratch_shapes=[
                pltpu.VMEM((1, tq), jnp.float32),    # running max
                pltpu.VMEM((1, tq), jnp.float32),    # running sum
                pltpu.VMEM((cp, tq), jnp.float32),   # output accumulator
            ],
        ),
        compiler_params=pltpu.CompilerParams(
            # batch & query-tile axes are independent (feeds both v7x cores);
            # key-tile axis is the online-softmax reduction -> arbitrary.
            dimension_semantics=("parallel", "parallel", "arbitrary"),
            vmem_limit_bytes=vmem_limit_bytes),
        cost_estimate=attn_cost,
    )(x_res, q, k, v, gamma_arr)

    return out_pad[:, :C, :N].reshape(B, C, H, W)


# -----------------------------------------------------------------------------
# Pure-JAX reference mirroring the PyTorch forward
# -----------------------------------------------------------------------------
def pam_reference(x, wq, bq, wk, bk, wv, bv, gamma):
    B, C, H, W = x.shape
    N = H * W
    xf = x.reshape(B, C, N).astype(jnp.float32)
    q = jnp.einsum('oc,bcn->bon', wq, xf) + bq[None, :, None]
    k = jnp.einsum('oc,bcn->bon', wk, xf) + bk[None, :, None]
    v = jnp.einsum('oc,bcn->bon', wv, xf) + bv[None, :, None]
    energy = jnp.einsum('bci,bcj->bij', q, k)
    attn = jax.nn.softmax(energy, axis=-1)
    out = jnp.einsum('bcj,bij->bci', v, attn)
    out = gamma * out + xf
    return out.reshape(B, C, H, W)


if __name__ == "__main__":
    def init_params(key, C):
        C8 = C // 8
        kq, kbq, kk, kbk, kv, kbv = jax.random.split(key, 6)
        bound = 1.0 / math.sqrt(C)
        u = lambda kk_, shape: jax.random.uniform(
            kk_, shape, minval=-bound, maxval=bound, dtype=jnp.float32)
        return (u(kq, (C8, C)), u(kbq, (C8,)), u(kk, (C8, C)), u(kbk, (C8,)),
                u(kv, (C, C)), u(kbv, (C,)))

    key = jax.random.PRNGKey(0)
    k1, k2, kp1, kp2 = jax.random.split(key, 4)

    # --- test 1: N = 256 (multiple of 128) -> 2x2 query/key tile grid --------
    B, C, H, W = 2, 16, 16, 16
    x = jax.random.normal(k1, (B, C, H, W), dtype=jnp.float32)
    wq, bq, wk, bk, wv, bv = init_params(kp1, C)
    # Module inits gamma to 0 (out == x); use nonzero so attention is exercised.
    gamma = jnp.array([0.5], dtype=jnp.float32)

    out = jax.block_until_ready(pam_forward(x, wq, bq, wk, bk, wv, bv, gamma))
    ref = pam_reference(x, wq, bq, wk, bk, wv, bv, gamma)
    # bf16 MXU inputs + approx reciprocal -> tolerance loosened vs f32 reference.
    np.testing.assert_allclose(np.asarray(out), np.asarray(ref), rtol=3e-2, atol=3e-2)

    # --- test 2: N = 81 (exercises spatial padding + key masking path) -------
    B2, C2, H2, W2 = 1, 16, 9, 9
    x2 = jax.random.normal(k2, (B2, C2, H2, W2), dtype=jnp.float32)
    wq2, bq2, wk2, bk2, wv2, bv2 = init_params(kp2, C2)
    gamma2 = jnp.array([0.75], dtype=jnp.float32)

    out2 = jax.block_until_ready(
        pam_forward(x2, wq2, bq2, wk2, bk2, wv2, bv2, gamma2))
    ref2 = pam_reference(x2, wq2, bq2, wk2, bk2, wv2, bv2, gamma2)
    np.testing.assert_allclose(np.asarray(out2), np.asarray(ref2), rtol=3e-2, atol=3e-2)

    print("KERNEL_OK")
</pallas_src>

<mosaic_0001>
module attributes {stable_mosaic.version = 11 : i64} {
  func.func @kernel(%arg0: i32, %arg1: i32, %arg2: memref<1x17x256xbf16, #tpu.memory_space<vmem>>, %arg3: memref<32x17xbf16, #tpu.memory_space<vmem>>, %arg4: memref<1x8x256xbf16, #tpu.memory_space<vmem>>, %arg5: memref<1x8x256xbf16, #tpu.memory_space<vmem>>, %arg6: memref<1x16x256xbf16, #tpu.memory_space<vmem>>) attributes {dimension_semantics = [#tpu.dimension_semantics<parallel>, #tpu.dimension_semantics<parallel>], iteration_bounds = array<i64: 2, 1>, scalar_prefetch = 0 : i64, scratch_operands = 0 : i64, tpu.core_type = #tpu.core_type<tc>, window_params = [{transform_indices = @transform_0, window_bounds = array<i64: 1, 17, 256>}, {pipeline_mode = #tpu.pipeline_mode<synchronous>, transform_indices = @transform_1, window_bounds = array<i64: 32, 17>}, {transform_indices = @transform_2, window_bounds = array<i64: 1, 8, 256>}, {transform_indices = @transform_3, window_bounds = array<i64: 1, 8, 256>}, {transform_indices = @transform_4, window_bounds = array<i64: 1, 16, 256>}]} {
    %c0 = arith.constant 0 : index
    %c0_0 = arith.constant 0 : index
    %c0_1 = arith.constant 0 : index
    %0 = vector.load %arg2[%c0, %c0_0, %c0_1] : memref<1x17x256xbf16, #tpu.memory_space<vmem>>, vector<1x17x256xbf16>
    %1 = vector.shape_cast %0 : vector<1x17x256xbf16> to vector<17x256xbf16>
    %c0_2 = arith.constant 0 : index
    %c0_3 = arith.constant 0 : index
    %2 = vector.load %arg3[%c0_2, %c0_3] : memref<32x17xbf16, #tpu.memory_space<vmem>>, vector<32x17xbf16>
    %cst = arith.constant dense<0.000000e+00> : vector<32x256xf32>
    %3 = tpu.matmul %2, %1, %cst {dimension_numbers = #tpu.dot_dimension_numbers<[1], [0], [0], [1], [0, 0, 1, 1], [], []>} : vector<32x17xbf16>, vector<17x256xbf16>, vector<32x256xf32> -> vector<32x256xf32>
    %4 = vector.extract_strided_slice %3 {offsets = [0, 0], sizes = [8, 256], strides = [1, 1]} : vector<32x256xf32> to vector<8x256xf32>
    %5 = arith.truncf %4 : vector<8x256xf32> to vector<8x256xbf16>
    %c0_4 = arith.constant 0 : index
    %c0_5 = arith.constant 0 : index
    %c0_6 = arith.constant 0 : index
    %6 = vector.load %arg4[%c0_4, %c0_5, %c0_6] : memref<1x8x256xbf16, #tpu.memory_space<vmem>>, vector<1x8x256xbf16>
    %7 = vector.shape_cast %6 : vector<1x8x256xbf16> to vector<8x256xbf16>
    %8 = vector.shape_cast %5 : vector<8x256xbf16> to vector<1x8x256xbf16>
    tpu.vector_store %arg4[%c0_4, %c0_5, %c0_6], %8 {strides = array<i32>} : memref<1x8x256xbf16, #tpu.memory_space<vmem>>, vector<1x8x256xbf16>,
    %9 = vector.extract_strided_slice %3 {offsets = [8, 0], sizes = [8, 256], strides = [1, 1]} : vector<32x256xf32> to vector<8x256xf32>
    %10 = arith.truncf %9 : vector<8x256xf32> to vector<8x256xbf16>
    %c0_7 = arith.constant 0 : index
    %c0_8 = arith.constant 0 : index
    %c0_9 = arith.constant 0 : index
    %11 = vector.load %arg5[%c0_7, %c0_8, %c0_9] : memref<1x8x256xbf16, #tpu.memory_space<vmem>>, vector<1x8x256xbf16>
    %12 = vector.shape_cast %11 : vector<1x8x256xbf16> to vector<8x256xbf16>
    %13 = vector.shape_cast %10 : vector<8x256xbf16> to vector<1x8x256xbf16>
    tpu.vector_store %arg5[%c0_7, %c0_8, %c0_9], %13 {strides = array<i32>} : memref<1x8x256xbf16, #tpu.memory_space<vmem>>, vector<1x8x256xbf16>,
    %14 = vector.extract_strided_slice %3 {offsets = [16, 0], sizes = [16, 256], strides = [1, 1]} : vector<32x256xf32> to vector<16x256xf32>
    %15 = arith.truncf %14 : vector<16x256xf32> to vector<16x256xbf16>
    %c0_10 = arith.constant 0 : index
    %c0_11 = arith.constant 0 : index
    %c0_12 = arith.constant 0 : index
    %16 = vector.load %arg6[%c0_10, %c0_11, %c0_12] : memref<1x16x256xbf16, #tpu.memory_space<vmem>>, vector<1x16x256xbf16>
    %17 = vector.shape_cast %16 : vector<1x16x256xbf16> to vector<16x256xbf16>
    %18 = vector.shape_cast %15 : vector<16x256xbf16> to vector<1x16x256xbf16>
    tpu.vector_store %arg6[%c0_10, %c0_11, %c0_12], %18 {strides = array<i32>} : memref<1x16x256xbf16, #tpu.memory_space<vmem>>, vector<1x16x256xbf16>,
    return
  }
  func.func @transform_0(%arg0: i32, %arg1: i32) -> (i32, i32, i32) {
    %c0_i32 = arith.constant 0 : i32
    %c0_i32_0 = arith.constant 0 : i32
    return %arg0, %c0_i32, %arg1 : i32, i32, i32
  }
  func.func @transform_1(%arg0: i32, %arg1: i32) -> (i32, i32) {
    %c0_i32 = arith.constant 0 : i32
    %c0_i32_0 = arith.constant 0 : i32
    %c0_i32_1 = arith.constant 0 : i32
    return %c0_i32, %c0_i32_0 : i32, i32
  }
  func.func @transform_2(%arg0: i32, %arg1: i32) -> (i32, i32, i32) {
    %c0_i32 = arith.constant 0 : i32
    %c0_i32_0 = arith.constant 0 : i32
    return %arg0, %c0_i32, %arg1 : i32, i32, i32
  }
  func.func @transform_3(%arg0: i32, %arg1: i32) -> (i32, i32, i32) {
    %c0_i32 = arith.constant 0 : i32
    %c0_i32_0 = arith.constant 0 : i32
    return %arg0, %c0_i32, %arg1 : i32, i32, i32
  }
  func.func @transform_4(%arg0: i32, %arg1: i32) -> (i32, i32, i32) {
    %c0_i32 = arith.constant 0 : i32
    %c0_i32_0 = arith.constant 0 : i32
    return %arg0, %c0_i32, %arg1 : i32, i32, i32
  }
}

</mosaic_0001>

<bundles_post_ra>
// kernel: tpu_custom_call.1
= control target key start
LH: loop header
LB: loop body
LE: loop exit
PB: predicated region body
PF: predicated region fallthrough
CT: control target
= control target key end

     0   :  { %s1083_s0 = inlined_call_operand.vmem [shape: bf16[2,17,256], index: 0, kind: input, shape index: {}]   ;;  %s1084_s1 = inlined_call_operand.vmem [shape: bf16[32,17], index: 1, kind: input, shape index: {}]   ;;  %s1085_s2 = inlined_call_operand.hbm [shape: bf16[2,8,256], index: 2, kind: output, shape index: {0}]   ;;  %s1086_s3 = inlined_call_operand.hbm [shape: bf16[2,8,256], index: 3, kind: output, shape index: {1}]   ;;  %s1087_s4 = inlined_call_operand.hbm [shape: bf16[2,16,256], index: 4, kind: output, shape index: {2}]  }
   0x1   :  { %1089 = sst [smem:[#allocation9_spill]] %s1083_s0 }
   0x2   :  { %1090 = sst [smem:[#allocation10_spill]] %s1084_s1 }
   0x3   :  { %10 = vsyncpa [#allocation3], 0 }
   0x4   :  { %12 = vsyncpa [#allocation3 + $0x1], 0 }
   0x5   :  { %13 = vsyncpa [#allocation5], 0 }
   0x6   :  { %15 = vsyncpa [#allocation5 + $0x1], 0  ;;  %s879_s15 = smov 0   ;;  %s881_s16 = smov 0  }
   0x7   :  { %s883_s17 = smov 0   ;;  %s885_s18 = smov 0  }
   0x8   :  { %s887_s19 = smov 0   ;;  %s889_s20 = smov 0  }
   0x9 LB: > { %s589_s21 = sadd.s32 4294967295, %s846_s20   ;;  %s1088_s22 = sadd.s32 4294967294, %s846_s20   ;;  %s846_s20 = sphi %s889_s20, %s21_s20   ;;  %s842_s19 = sphi %s887_s19, %s1100_s19   ;;  %s838_s18 = sphi %s885_s18, %s1099_s18   ;;  %s834_s17 = sphi %s883_s17, %s1098_s17   ;;  %s830_s16 = sphi %s881_s16, %s1097_s16   ;;  %s826_s15 = sphi %s879_s15, %s1096_s15  }
   0xa   : > { %s33_s23 = sadd.s32 1, %s842_s19  ;;  %s91_s24 = sadd.s32 1, %s834_s17 }
   0xb   : > { %p35_p0 = scmp.ge.s32.totalorder %s33_s23, 2  ;;  %p101_p1 = scmp.ne.s32.totalorder %s834_s17, %s830_s16 }
   0xc   : > { %p102_p2 = scmp.eq.s32.totalorder %s589_s21, 1  ;;  %p107_p3 = scmp.ne.s32.totalorder %s830_s16, %s826_s15 }
   0xd   : > { %s1102_s23 = smov (%p35_p0, %s33_s23), 0  ;;  %p108_p5 = scmp.eq.s32.totalorder %s1088_s22, 1 }
   0xe   : > { %p921_p4 = por %p102_p2, %p101_p1  ;;  %s86_s26 = ssub.s32 %s842_s19, %s1102_s23 }
   0xf   : > { %p593_p6 = scmp.ge.s32.totalorder %s846_s20, 1  ;;  %p89_p7 = scmp.eq.s32.totalorder %s86_s26, 0 }
  0x10   : > { %p930_p8 = por %p108_p5, %p107_p3  ;;  %p198_p9 = scmp.lt.s32.totalorder %s846_s20, 3 }
  0x11   : > { %s936_s28 = scalar_select %p89_p7, %s834_s17, %s91_s24  }
  0x12   : > { %p199_p10 = pnand %p593_p6, %p198_p9 }
  0x13   : > { %p239_p11 = scmp.lt.s32.totalorder (!%p199_p10), %s838_s18, 1  ;;  %v848_v0 = vmov (!%p199_p10), 0   ;;  %vm291_vm0 = vcmask (!%p199_p10), 1040384   ;;  %s1093_s0 = sld [smem:[#allocation9_spill]] (!%p199_p10)  ;;  %vm284_vm1 = vcmask (!%p199_p10), 138240  }
  0x14   : > { %202 = sbr.rel (%p199_p10) target bundleno = 316 (0x13c), region = 28  ;;  %332 = vmatprep.mubr.bf16.mxu0 (!%p199_p10), %v848_v0  ;;  %342 = vmatprep.mubr.bf16.mxu1 (!%p199_p10), %v848_v0  ;;  %v293_v4 = vsel (!%p199_p10), %vm291_vm0, 65535, %v848_v0  ;;  %s1094_s1 = sld [smem:[#allocation10_spill]] (!%p199_p10) }
  0x15   : > { %s950_s12 = sand.u32 (!%p199_p10), 1, %s830_s16   ;;  %s627_s9 = sshll.u32 (!%p199_p10), %s838_s18, 8 }
  0x16   : > { %s596_s13 = sshll.u32 (!%p199_p10), %s950_s12, 4  ;;  %s594_s14 = sshll.u32 (!%p199_p10), %s950_s12, 3 }
  0x17   : > { %s954_s24 = scalar_lea.vmem (!%p199_p10), [#allocation6], %s596_s13  ;;  %s223_s5 = scalar_lea.vmem (!%p199_p10), [#allocation2], %s594_s14 }
  0x18   : > { %s443_s26 = sshll.u32 (!%p199_p10), %s954_s24, 4  ;;  %s412_s6 = sshll.u32 (!%p199_p10), %s223_s5, 4  ;;  %s961_s26 = int_to_ptr.vmem [resolvable:$true] %s443_s26  ;;  %s978_s6 = int_to_ptr.vmem [resolvable:$true] %s412_s6 }
  0x19   : > { %s985_s11 = scalar_lea.hbm (!%p199_p10), %s1087_s4, %s627_s9  ;;  %s708_s13 = scalar_lea.vmem (!%p199_p10), %s978_s6, 128 }
  0x1a   : > { %v706_v9 = vld [vmem:[%s1094_s1] sm:$0xff] (!%p199_p10)   ;;  %v707_v10 = vld [vmem:[%s1094_s1 + $0x8] sm:$0xff] (!%p199_p10)   ;;  %p709_p12 = scmp.ne.s32.totalorder (!%p199_p10), %s978_s6, %s708_s13 }
  0x1b   : > { %s240_s29 = scalar_select %p239_p11, %s838_s18, 1 }
  0x1c   : > { %p710_p13 = pnand %p709_p12, %p921_p4 }
  0x1d   : > { %s632_s30 = smul.u32 24, %s240_s29  ;;  %s959_s29 = sand.u32 1, %s589_s21  }
  0x1e   : > { %p711_p0 = pneg %p710_p13 }
  0x1f   : > { %s246_s7 = scalar_lea.vmem %s1093_s0, %s632_s30  ;;  %s625_s30 = sshll.u32 %s838_s18, 7 }
  0x20   : > { %v701_v1 = vld [vmem:[%s246_s7 + $0x4] ss:$8 sps:$4 sm:$0xff]   ;;  %v703_v2 = vld [vmem:[%s246_s7] ss:$8 sps:$4 sm:$0xff]   ;;  %v254_v3 = vld [vmem:[%s246_s7 + $0x10] sm:$0x11]  ;;  %s971_s21 = scalar_lea.hbm %s1086_s3, %s625_s30  ;;  %s976_s22 = scalar_lea.hbm %s1085_s2, %s625_s30 }
  0x21   : > { %300 = vmatprep.subr.bf16.mxu0 %v701_v1  ;;  %628 = vmatprep.subr.bf16.mxu1 %v701_v1  ;;  %v603_v5 = vcombine.high %v254_v3, %v254_v3  ;;  %v602_v6 = vcombine.low %v254_v3, %v254_v3  ;;  %s964_s7 = scalar_lea.vmem [#allocation4], %s594_s14  ;;  %s386_s30 = scalar_lea.sflag [#allocation3], %s950_s12 }
  0x22   : > { %301 = vmatpush1.bf16.msra.mxu0 %v703_v2  ;;  %630 = vmatpush1.bf16.msra.mxu1 %v703_v2  ;;  %s428_s8 = sshll.u32 %s964_s7, 4  ;;  %s849_s14 = smov [#allocation2]   ;;  %s980_s8 = int_to_ptr.vmem [resolvable:$true] %s428_s8 }
  0x23   : > { %v298_v7 = vand.u32 %v603_v5, %v293_v4  ;;  %v295_v8 = vand.u32 %v602_v6, %v293_v4  ;;  %s712_s0 = sshll.u32 %s849_s14, 4  ;;  %s713_s0 = int_to_ptr.vmem [resolvable:$false] %s712_s0 }
  0x24   : > { %s714_s1 = scalar_lea.vmem %s713_s0, 256  ;;  %p715_p1 = scmp.lt.s32.totalorder %s978_s6, %s713_s0 }
  0x25   : > { %302 = vmatprep.subr.bf16.mxu0 %v298_v7  ;;  %629 = vmatprep.subr.bf16.mxu1 %v298_v7  ;;  %p716_p2 = scmp.lt.s32.totalorder %s714_s1, %s708_s13 }
  0x26   : > { %303 = vmatpush1.bf16.msra.mxu0 %v295_v8  ;;  %631 = vmatpush1.bf16.msra.mxu1 %v295_v8 }
  0x27   : > { %p717_p3 = por %p716_p2, %p715_p1 }
  0x29   : > { %604 = vmatmul.mubr.msk.bf16.vlgmr.msra.gmra.mrb[0].mxu0 %vm284_vm1, %v706_v9  ;;  %605 = vmatmul.mubr.msk.bf16.vlgmr.msra.gmra.mrb[0].mxu1 %vm284_vm1, %v707_v10  ;;  %p718_p5 = pnand %p717_p3, %p711_p0 }
  0xfc   : > { %v334_v11 = vpop.f32.mrb[0].mxu0  ;;  %v344_v12 = vpop.f32.mrb[0].mxu1 }
  0xfd   : > { %v336_v13 = vpop.f32.mrb[1].mxu0  ;;  %v346_v14 = vpop.f32.mrb[1].mxu1 }
  0xfe   : > { %v621_v15 = vpack.c.bf16 %v336_v13, %v334_v11  ;;  %v623_v16 = vpack.c.bf16 %v346_v14, %v344_v12  ;;  %v338_v17 = vpop.f32.mrb[2].mxu0  ;;  %v348_v18 = vpop.f32.mrb[2].mxu1 }
  0xff   : > { %v340_v19 = vpop.f32.mrb[3].mxu0  ;;  %v350_v20 = vpop.f32.mrb[3].mxu1 }
 0x100   : > { %361 = vst [vmem:[%s223_s5] sm:$0xff] %v621_v15  ;;  %383 = vst [vmem:[%s954_s24] sm:$0xff] %v623_v16  ;;  %v622_v21 = vpack.c.bf16 %v340_v19, %v338_v17  ;;  %v624_v22 = vpack.c.bf16 %v350_v20, %v348_v18 }
 0x101   : > { %721 = shalt.err (!%p718_p5)
}
 0x102   : > { %s722_s12 = scalar_lea.hbm %s976_s22, 128  ;;  %s726_s18 = scalar_lea.hbm %s1085_s2, 256 }
 0x103   : > { %p723_p6 = scmp.ne.s32.totalorder %s976_s22, %s722_s12  ;;  %p727_p10 = scmp.lt.u32.totalorder %s976_s22, %s1085_s2 }
 0x104   : > { %p728_p11 = scmp.lt.u32.totalorder %s726_s18, %s722_s12  ;;  %p730_p13 = scmp.lt.u32.totalorder %s722_s12, %s976_s22 }
 0x105   : > { %p724_p7 = pnand %p723_p6, %p921_p4 }
 0x106   : > { %p729_p12 = por %p728_p11, %p727_p10 }
 0x107   : > { %p725_p9 = pneg %p724_p7 }
 0x108   : > { %p731_p0 = por %p730_p13, %p729_p12 }
 0x10a   : > { %p732_p1 = pnand %p731_p0, %p725_p9 }
 0x10c   : > { %735 = shalt.err (!%p732_p1)
}
 0x10d   : > { %633 = dma.vmem_to_hbm [thread:$0]  (%p921_p4), %s978_s6, 128, %s976_s22, %s386_s30   ;;  %370 = vst [vmem:[%s964_s7] sm:$0xff] %v622_v21  ;;  %384 = vst [vmem:[%s954_s24 + $0x8] sm:$0xff] %v624_v22 }
 0x10e   : > { %s391_s1 = scalar_lea.sflag [#allocation5], %s959_s29  ;;  %s736_s13 = scalar_lea.vmem %s980_s8, 128 }
 0x10f   : > { %p737_p2 = scmp.ne.s32.totalorder %s980_s8, %s736_s13  ;;  %s850_s14 = smov [#allocation4]  }
 0x110   : > { %s740_s12 = sshll.u32 %s850_s14, 4  ;;  %s741_s12 = int_to_ptr.vmem [resolvable:$false] %s740_s12 }
 0x111   : > { %p738_p3 = pnand %p737_p2, %p921_p4  ;;  %s742_s5 = scalar_lea.vmem %s741_s12, 256 }
 0x112   : > { %p743_p6 = scmp.lt.s32.totalorder %s980_s8, %s741_s12  ;;  %p744_p7 = scmp.lt.s32.totalorder %s742_s5, %s736_s13 }
 0x113   : > { %p739_p5 = pneg %p738_p3 }
 0x114   : > { %p745_p9 = por %p744_p7, %p743_p6 }
 0x116   : > { %p746_p10 = pnand %p745_p9, %p739_p5 }
 0x118   : > { %749 = shalt.err (!%p746_p10)
}
 0x119   : > { %s750_s22 = scalar_lea.hbm %s971_s21, 128  ;;  %s754_s7 = scalar_lea.hbm %s1086_s3, 256 }
 0x11a   : > { %p751_p11 = scmp.ne.s32.totalorder %s971_s21, %s750_s22  ;;  %p755_p0 = scmp.lt.u32.totalorder %s971_s21, %s1086_s3 }
 0x11b   : > { %p756_p1 = scmp.lt.u32.totalorder %s754_s7, %s750_s22  ;;  %p758_p3 = scmp.lt.u32.totalorder %s750_s22, %s971_s21 }
 0x11c   : > { %p752_p12 = pnand %p751_p11, %p921_p4 }
 0x11d   : > { %p757_p2 = por %p756_p1, %p755_p0 }
 0x11e   : > { %p753_p13 = pneg %p752_p12 }
 0x11f   : > { %p759_p5 = por %p758_p3, %p757_p2 }
 0x121   : > { %p760_p6 = pnand %p759_p5, %p753_p13 }
 0x123   : > { %763 = shalt.err (!%p760_p6)
}
 0x124   : > { %634 = dma.vmem_to_hbm [thread:$0]  (%p921_p4), %s980_s8, 128, %s971_s21, %s391_s1  }
 0x125   : > { %s764_s18 = scalar_lea.vmem %s961_s26, 256  ;;  %s851_s10 = smov [#allocation6]  }
 0x126   : > { %p765_p7 = scmp.ne.s32.totalorder %s961_s26, %s764_s18  ;;  %s768_s0 = sshll.u32 %s851_s10, 4  ;;  %s769_s0 = int_to_ptr.vmem [resolvable:$false] %s768_s0 }
 0x127   : > { %s770_s13 = scalar_lea.vmem %s769_s0, 512  ;;  %p771_p11 = scmp.lt.s32.totalorder %s961_s26, %s769_s0 }
 0x128   : > { %p766_p9 = pnand %p765_p7, %p921_p4  ;;  %p772_p12 = scmp.lt.s32.totalorder %s770_s13, %s764_s18 }
 0x12a   : > { %p767_p10 = pneg %p766_p9  ;;  %p773_p13 = por %p772_p12, %p771_p11 }
 0x12c   : > { %p774_p0 = pnand %p773_p13, %p767_p10 }
 0x12e   : > { %777 = shalt.err (!%p774_p0)
}
 0x12f   : > { %s778_s8 = scalar_lea.hbm %s985_s11, 256  ;;  %s782_s12 = scalar_lea.hbm %s1087_s4, 512 }
 0x130   : > { %p779_p1 = scmp.ne.s32.totalorder %s985_s11, %s778_s8  ;;  %p783_p5 = scmp.lt.u32.totalorder %s985_s11, %s1087_s4 }
 0x131   : > { %p784_p6 = scmp.lt.u32.totalorder %s782_s12, %s778_s8  ;;  %p786_p9 = scmp.lt.u32.totalorder %s778_s8, %s985_s11 }
 0x132   : > { %p780_p2 = pnand %p779_p1, %p921_p4 }
 0x133   : > { %p785_p7 = por %p784_p6, %p783_p5 }
 0x134   : > { %p781_p3 = pneg %p780_p2 }
 0x135   : > { %p787_p10 = por %p786_p9, %p785_p7 }
 0x137   : > { %p788_p11 = pnand %p787_p10, %p781_p3 }
 0x139   : > { %791 = shalt.err (!%p788_p11)
}
 0x13a   : > { %s852_s24 = smov 128   ;;  %s853_s6 = smov 8  }
 0x13b   : > { %635 = dma.vmem_to_hbm [thread:$0]  (%p921_p4), %s961_s26, 256, %s985_s11, %s391_s1, %s852_s24, %s852_s24, %s853_s6  }
 0x13c PF: > { %p649_p12 = scmp.ge.s32.totalorder %s846_s20, 2  ;;  %s458_s7 = sand.u32 1, %s826_s15  }
 0x13d   : > { %s459_s30 = scalar_lea.sflag [#allocation3], %s458_s7 }
 0x13e   : > { %p640_p13 = pnand %p649_p12, %p930_p8 }
 0x140   : > { %817 = dma.done.wait (!%p640_p13), %s459_s30, 128  }
 0x141   : > { %819 = vsyncadd (!%p640_p13), %s459_s30, 4294967168  ;;  %s1095_s9 = sadd.s32 4294967294, %s846_s20  }
 0x142   : > { %s467_s18 = sand.u32 1, %s1095_s9  }
 0x143   : > { %s468_s10 = scalar_lea.sflag [#allocation5], %s467_s18 }
 0x144   : > { %821 = dma.done.wait (!%p640_p13), %s468_s10, 384  }
 0x145   : > { %823 = vsyncadd (!%p640_p13), %s468_s10, 4294966912  ;;  %s21_s20 = sadd.s32 1, %s846_s20   ;;  %s1096_s15 = smov %s830_s16 }
 0x146   : > { %p18_p4 = scmp.ge.s32.totalorder %s21_s20, 4   ;;  %s1097_s16 = smov %s834_s17 }
 0x147   : > { %s1098_s17 = smov %s936_s28  ;;  %s1099_s18 = smov %s842_s19 }
 0x148   : > { %s1100_s19 = smov %s1102_s23  ;;  %20 = sbr.rel (!%p18_p4) target bundleno = 9 (0x9), region = 95 }
 0x14f   :  { %482 = vsyncpa [#allocation3], 1 }
 0x150   :  { %484 = vsyncpa [#allocation3 + $0x1], 1 }
 0x151   :  { %485 = vsyncpa [#allocation5], 1 }
 0x152   :  { %487 = vsyncpa [#allocation5 + $0x1], 1 }

</bundles_post_ra>
